<compile_context>
chip_gen: v5e
topology: v5e:2x2
jax: 0.10.0
libtpu: 0.0.40
codegen_flags: <defaults>
</compile_context>

<pallas_src>
import jax
import jax.numpy as jnp
from jax.experimental import pallas as pl
from jax.experimental.pallas import tpu as pltpu

DEFAULT_THRESHOLD = 0.005


def _round_up(x, m):
    return ((x + m - 1) // m) * m


def _sublane(dtype):
    # min second-to-last tile dim: f32 -> 8, bf16 -> 16, int8/fp8 -> 32
    return max(8, 32 // jnp.dtype(dtype).itemsize)


def _pick_tile(dim, align, max_tile, max_pad_frac=0.125):
    """Largest tile (multiple of `align`, <= max_tile) with bounded pad waste."""
    dp = _round_up(dim, align)
    if dp <= max_tile:
        return dp                          # whole dim in one tile (alignment pad only)
    best_t, best_pad = align, _round_up(dim, align) - dim
    t = (max_tile // align) * align
    while t >= align:
        pad = _round_up(dim, t) - dim
        if pad < best_pad or (pad == best_pad and t > best_t):
            best_t, best_pad = t, pad
        if pad <= max_pad_frac * dim:
            return t                       # largest tile with acceptable pad
        t -= align
    return best_t                          # fall back: minimal-pad tile


def _matmul_bias_kernel(x_ref, w_ref, b_ref, o_ref, acc_ref):
    """o = x @ w + b, tiled over (M, N, K) with K as the reduction (last) axis."""
    k = pl.program_id(2)
    prod = jnp.dot(x_ref[...], w_ref[...], preferred_element_type=jnp.float32)

    @pl.when(k == 0)
    def _first():
        acc_ref[...] = prod                # store directly; no zero-fill + add

    @pl.when(k > 0)
    def _accumulate():
        acc_ref[...] += prod

    @pl.when(k == pl.num_programs(2) - 1)
    def _finalize():
        o_ref[...] = (acc_ref[...] + b_ref[...].astype(jnp.float32)).astype(o_ref.dtype)


def prepare_element_wise_linear(weight, mask, bias=None, *,
                                threshold=DEFAULT_THRESHOLD, le_value=0.0,
                                compute_dtype=None, tn=None, tk=None):
    """One-time preprocessing: fold the binarized mask into the weight, transpose
    to (K, N), pad to tile-aligned lane-dense shapes, optionally cast.

    weight: (out_features, in_features)   -- PyTorch nn.Linear layout
    mask:   (out_features, in_features)   -- real-valued mask (compared in its own dtype)
    bias:   (out_features,) or None
    """
    N, K = weight.shape
    assert mask.shape == weight.shape

    # Binarizer (>thr -> 1, <=thr -> le) folded into the weight: w_eff = mask_bin * w.
    keep = mask > threshold
    if float(le_value) == 0.0:
        w_eff = jnp.where(keep, weight, jnp.zeros_like(weight))
    else:
        w_eff = jnp.where(keep, weight, jnp.asarray(le_value, weight.dtype) * weight)
    if compute_dtype is not None:
        w_eff = w_eff.astype(compute_dtype)

    # Pre-transpose to (K, N): kernel does a plain (M,K)@(K,N) MXU matmul.
    w_t = jnp.transpose(w_eff)

    if tn is None:
        tn = _pick_tile(N, 128, 512)
    if tk is None:
        tk = _pick_tile(K, 128, 512)
    Kp, Np = _round_up(K, tk), _round_up(N, tn)

    w_p = jnp.pad(w_t, ((0, Kp - K), (0, Np - N)))
    if bias is None:
        b_p = jnp.zeros((1, Np), jnp.float32)
    else:
        b_p = jnp.pad(bias.astype(jnp.float32).reshape(1, N), ((0, 0), (0, Np - N)))

    return {"w": w_p, "b": b_p, "N": N, "K": K, "tn": tn, "tk": tk,
            "compute_dtype": compute_dtype}


def element_wise_linear_apply(params, x, *, tm=None):
    """Per-call path: pad x, run the tiled matmul+bias kernel, slice off the pad."""
    M, K = x.shape
    assert K == params["K"], "in_features mismatch"
    w, b = params["w"], params["b"]
    Kp, Np = w.shape
    N, tn, tk = params["N"], params["tn"], params["tk"]
    compute_dtype = params["compute_dtype"]
    out_dtype = x.dtype

    xin = x if compute_dtype is None else x.astype(compute_dtype)
    sub = max(_sublane(xin.dtype), _sublane(out_dtype))
    if tm is None:
        tm = _pick_tile(M, sub, 512)
    else:
        tm = max(sub, _round_up(min(tm, _round_up(M, sub)), sub))
    Mp = _round_up(M, tm)
    xp = jnp.pad(xin, ((0, Mp - M), (0, Kp - K)))

    # v7x has 2 TensorCores sharded over the "parallel" axes: if M has a single
    # tile, split N into two tiles when possible so both cores get work.
    if Mp // tm == 1 and Np // tn == 1 and Np % 256 == 0:
        tn = Np // 2

    grid = (Mp // tm, Np // tn, Kp // tk)

    # Scoped-VMEM sizing: double-buffered inputs/output + f32 accumulator.
    est = 2 * (tm * tk * xp.dtype.itemsize
               + tk * tn * w.dtype.itemsize
               + tn * 4
               + tm * tn * jnp.dtype(out_dtype).itemsize) + tm * tn * 4
    cp_kwargs = dict(dimension_semantics=("parallel", "parallel", "arbitrary"))
    if int(1.5 * est) > 32 * 1024 * 1024:
        # Only raise above the scoped default when needed; keep v7x headroom.
        cp_kwargs["vmem_limit_bytes"] = int(min(1.5 * est, 48 * 1024 * 1024))

    out = pl.pallas_call(
        _matmul_bias_kernel,
        out_shape=jax.ShapeDtypeStruct((Mp, Np), out_dtype),
        grid_spec=pltpu.PrefetchScalarGridSpec(
            num_scalar_prefetch=0,
            grid=grid,
            in_specs=[
                pl.BlockSpec((tm, tk), lambda i, j, k: (i, k)),   # x tile
                pl.BlockSpec((tk, tn), lambda i, j, k: (k, j)),   # effective weight tile
                pl.BlockSpec((1, tn), lambda i, j, k: (0, j)),    # bias tile
            ],
            out_specs=pl.BlockSpec((tm, tn), lambda i, j, k: (i, j)),
            scratch_shapes=[pltpu.VMEM((tm, tn), jnp.float32)],
        ),
        compiler_params=pltpu.CompilerParams(**cp_kwargs),
    )(xp, w, b)

    return out[:M, :N]


def element_wise_linear(x, weight, mask, bias=None, *,
                        threshold=DEFAULT_THRESHOLD, le_value=0.0,
                        compute_dtype=None, tm=None, tn=None, tk=None):
    """Convenience one-shot wrapper (prepare + apply). For repeated calls with the
    same weight/mask, call prepare_element_wise_linear once and reuse the params."""
    params = prepare_element_wise_linear(weight, mask, bias,
                                         threshold=threshold, le_value=le_value,
                                         compute_dtype=compute_dtype, tn=tn, tk=tk)
    return element_wise_linear_apply(params, x, tm=tm)


def _reference(x, weight, mask, bias, threshold=DEFAULT_THRESHOLD, le_value=0.0):
    mask_bin = jnp.where(mask > threshold, 1.0, le_value).astype(weight.dtype)
    return x @ (mask_bin * weight).T + bias[None, :]


# TODO(synk): Binarizer's straight-through backward (custom autograd) is not part
# of the forward pass and is not implemented here.

if __name__ == "__main__":
    # Module config (deterministic, synthetic): in_features=32, out_features=32,
    # bias=True, zero_out=True, mask_init='uniform', mask_scale=0.1.
    in_features = 32
    out_features = 32
    batch = 8
    mask_scale = 0.1

    key = jax.random.PRNGKey(0)
    kx, kw, km, kb, kx2 = jax.random.split(key, 5)

    x = jax.random.normal(kx, (batch, in_features), dtype=jnp.float32)
    weight = jax.random.normal(kw, (out_features, in_features), dtype=jnp.float32) * 0.05
    mask = jax.random.uniform(km, (out_features, in_features),
                              minval=-mask_scale, maxval=mask_scale, dtype=jnp.float32)
    bias = jax.random.normal(kb, (out_features,), dtype=jnp.float32) * 0.01

    # baseline='piggyback' (threshold=0.005, le=0), f32 path; prepare once, apply twice.
    params = prepare_element_wise_linear(weight, mask, bias,
                                         threshold=DEFAULT_THRESHOLD, le_value=0.0)
    out = jax.block_until_ready(element_wise_linear_apply(params, x))
    ref = _reference(x, weight, mask, bias, DEFAULT_THRESHOLD, 0.0)
    assert out.shape == (batch, out_features)
    assert jnp.allclose(out, ref, atol=1e-5, rtol=1e-5), "piggyback mismatch"

    x2 = jax.random.normal(kx2, (2 * batch, in_features), dtype=jnp.float32)
    out2 = jax.block_until_ready(element_wise_linear_apply(params, x2))
    ref2 = _reference(x2, weight, mask, bias, DEFAULT_THRESHOLD, 0.0)
    assert jnp.allclose(out2, ref2, atol=1e-5, rtol=1e-5), "cached-params mismatch"

    # baseline='piggyback_nonzero' (threshold=0, le=-1).
    out_nz = jax.block_until_ready(
        element_wise_linear(x, weight, mask, bias, threshold=0.0, le_value=-1.0))
    ref_nz = _reference(x, weight, mask, bias, 0.0, -1.0)
    assert jnp.allclose(out_nz, ref_nz, atol=1e-5, rtol=1e-5), "piggyback_nonzero mismatch"

    # bf16 MXU fast path (wrapper-side casts, f32 accumulation) -- looser tolerance.
    out_bf16 = jax.block_until_ready(
        element_wise_linear(x, weight, mask, bias,
                            threshold=DEFAULT_THRESHOLD, le_value=0.0,
                            compute_dtype=jnp.bfloat16))
    assert jnp.allclose(out_bf16, ref, atol=5e-2, rtol=5e-2), "bf16 mismatch"

    # Odd, non-aligned shapes to exercise padding / adaptive tiles.
    Mo, Ko, No = 40, 96, 80
    xo = jax.random.normal(kx, (Mo, Ko), dtype=jnp.float32)
    wo = jax.random.normal(kw, (No, Ko), dtype=jnp.float32) * 0.05
    mo = jax.random.uniform(km, (No, Ko), minval=-mask_scale, maxval=mask_scale,
                            dtype=jnp.float32)
    bo = jax.random.normal(kb, (No,), dtype=jnp.float32) * 0.01
    out_o = jax.block_until_ready(element_wise_linear(xo, wo, mo, bo))
    ref_o = _reference(xo, wo, mo, bo, DEFAULT_THRESHOLD, 0.0)
    assert out_o.shape == (Mo, No)
    assert jnp.allclose(out_o, ref_o, atol=1e-5, rtol=1e-5), "odd-shape mismatch"

    print("KERNEL_OK")
</pallas_src>

<mosaic_0001>
module attributes {stable_mosaic.version = 11 : i64} {
  func.func @_matmul_bias_kernel(%arg0: i32, %arg1: i32, %arg2: i32, %arg3: memref<8x128xf32, #tpu.memory_space<vmem>>, %arg4: memref<128x128xf32, #tpu.memory_space<vmem>>, %arg5: memref<1x128xf32, #tpu.memory_space<vmem>>, %arg6: memref<8x128xf32, #tpu.memory_space<vmem>>, %arg7: memref<8x128xf32, #tpu.memory_space<vmem>>) attributes {dimension_semantics = [#tpu.dimension_semantics<parallel>, #tpu.dimension_semantics<parallel>, #tpu.dimension_semantics<arbitrary>], iteration_bounds = array<i64: 1, 1, 1>, scalar_prefetch = 0 : i64, scratch_operands = 1 : i64, tpu.core_type = #tpu.core_type<tc>, window_params = [{transform_indices = @transform_0, window_bounds = array<i64: 8, 128>}, {transform_indices = @transform_1, window_bounds = array<i64: 128, 128>}, {transform_indices = @transform_2, window_bounds = array<i64: 1, 128>}, {transform_indices = @transform_3, window_bounds = array<i64: 8, 128>}]} {
    %c0 = arith.constant 0 : index
    %c0_0 = arith.constant 0 : index
    %0 = vector.load %arg3[%c0, %c0_0] : memref<8x128xf32, #tpu.memory_space<vmem>>, vector<8x128xf32>
    %c0_1 = arith.constant 0 : index
    %c0_2 = arith.constant 0 : index
    %1 = vector.load %arg4[%c0_1, %c0_2] : memref<128x128xf32, #tpu.memory_space<vmem>>, vector<128x128xf32>
    %cst = arith.constant dense<0.000000e+00> : vector<8x128xf32>
    %2 = tpu.matmul %0, %1, %cst {dimension_numbers = #tpu.dot_dimension_numbers<[1], [0], [0], [1], [0, 0, 1, 1], [], []>} : vector<8x128xf32>, vector<128x128xf32>, vector<8x128xf32> -> vector<8x128xf32>
    %c0_i32 = arith.constant 0 : i32
    %3 = arith.cmpi eq, %arg2, %c0_i32 : i32
    %4 = arith.extui %3 : i1 to i32
    %c0_i32_3 = arith.constant 0 : i32
    %5 = arith.cmpi ne, %4, %c0_i32_3 : i32
    scf.if %5 {
      %c0_8 = arith.constant 0 : index
      %c0_9 = arith.constant 0 : index
      %12 = vector.load %arg7[%c0_8, %c0_9] : memref<8x128xf32, #tpu.memory_space<vmem>>, vector<8x128xf32>
      tpu.vector_store %arg7[%c0_8, %c0_9], %2 {strides = array<i32>} : memref<8x128xf32, #tpu.memory_space<vmem>>, vector<8x128xf32>,
    } else {
    }
    %c0_i32_4 = arith.constant 0 : i32
    %6 = arith.cmpi sgt, %arg2, %c0_i32_4 : i32
    %7 = arith.extui %6 : i1 to i32
    %c0_i32_5 = arith.constant 0 : i32
    %8 = arith.cmpi ne, %7, %c0_i32_5 : i32
    scf.if %8 {
      %c0_8 = arith.constant 0 : index
      %c0_9 = arith.constant 0 : index
      %12 = vector.load %arg7[%c0_8, %c0_9] : memref<8x128xf32, #tpu.memory_space<vmem>>, vector<8x128xf32>
      %13 = arith.addf %12, %2 : vector<8x128xf32>
      %c0_10 = arith.constant 0 : index
      %c0_11 = arith.constant 0 : index
      %14 = vector.load %arg7[%c0_10, %c0_11] : memref<8x128xf32, #tpu.memory_space<vmem>>, vector<8x128xf32>
      tpu.vector_store %arg7[%c0_10, %c0_11], %13 {strides = array<i32>} : memref<8x128xf32, #tpu.memory_space<vmem>>, vector<8x128xf32>,
    } else {
    }
    %c0_i32_6 = arith.constant 0 : i32
    %9 = arith.cmpi eq, %arg2, %c0_i32_6 : i32
    %10 = arith.extui %9 : i1 to i32
    %c0_i32_7 = arith.constant 0 : i32
    %11 = arith.cmpi ne, %10, %c0_i32_7 : i32
    scf.if %11 {
      %c0_8 = arith.constant 0 : index
      %c0_9 = arith.constant 0 : index
      %12 = vector.load %arg7[%c0_8, %c0_9] : memref<8x128xf32, #tpu.memory_space<vmem>>, vector<8x128xf32>
      %c0_10 = arith.constant 0 : index
      %c0_11 = arith.constant 0 : index
      %13 = vector.load %arg5[%c0_10, %c0_11] : memref<1x128xf32, #tpu.memory_space<vmem>>, vector<1x128xf32>
      %14 = vector.broadcast %13 : vector<1x128xf32> to vector<8x128xf32>
      %15 = arith.addf %12, %14 : vector<8x128xf32>
      %c0_12 = arith.constant 0 : index
      %c0_13 = arith.constant 0 : index
      %16 = vector.load %arg6[%c0_12, %c0_13] : memref<8x128xf32, #tpu.memory_space<vmem>>, vector<8x128xf32>
      tpu.vector_store %arg6[%c0_12, %c0_13], %15 {strides = array<i32>} : memref<8x128xf32, #tpu.memory_space<vmem>>, vector<8x128xf32>,
    } else {
    }
    return
  }
  func.func @transform_0(%arg0: i32, %arg1: i32, %arg2: i32) -> (i32, i32) {
    %c0_i32 = arith.constant 0 : i32
    return %arg0, %arg2 : i32, i32
  }
  func.func @transform_1(%arg0: i32, %arg1: i32, %arg2: i32) -> (i32, i32) {
    %c0_i32 = arith.constant 0 : i32
    return %arg2, %arg1 : i32, i32
  }
  func.func @transform_2(%arg0: i32, %arg1: i32, %arg2: i32) -> (i32, i32) {
    %c0_i32 = arith.constant 0 : i32
    %c0_i32_0 = arith.constant 0 : i32
    return %c0_i32, %arg1 : i32, i32
  }
  func.func @transform_3(%arg0: i32, %arg1: i32, %arg2: i32) -> (i32, i32) {
    %c0_i32 = arith.constant 0 : i32
    return %arg0, %arg1 : i32, i32
  }
}

</mosaic_0001>

<bundles_post_ra>
// kernel: tpu_custom_call.1
= control target key start
LH: loop header
LB: loop body
LE: loop exit
PB: predicated region body
PF: predicated region fallthrough
CT: control target
= control target key end

     0   :  { %8 = vsyncpa [#allocation4], 0  ;;  %s243_s0 = inlined_call_operand.hbm [shape: f32[8,128], index: 0, kind: input, shape index: {}]   ;;  %s244_s1 = inlined_call_operand.hbm [shape: f32[128,128], index: 1, kind: input, shape index: {}]   ;;  %s245_s2 = inlined_call_operand.vmem [shape: f32[1,128], index: 2, kind: input, shape index: {}]   ;;  %s246_s3 = inlined_call_operand.hbm [shape: f32[8,128], index: 3, kind: output, shape index: {}]  }
   0x1   :  { %9 = vsyncpa [#allocation7], 0 }
   0x2   :  { %10 = vsyncpa [#allocation5], 0  ;;  %s16_s14 = sshll.u32 %s243_s0, 4  ;;  %s206_s15 = smov [#allocation3]   ;;  %s17_s14 = int_to_ptr.hbm [resolvable:$true] %s16_s14 }
   0x3   :  { %s18_s16 = sshll.u32 %s206_s15, 4  ;;  %s26_s19 = sshll.u32 %s244_s1, 4  ;;  %s19_s16 = int_to_ptr.vmem [resolvable:$true] %s18_s16  ;;  %s27_s19 = int_to_ptr.hbm [resolvable:$true] %s26_s19 }
   0x4   :  { %21 = dma.hbm_to_vmem [thread:$0]  %s17_s14, 128, %s19_s16, [#allocation4]  }
   0x5   :  { %s207_s20 = smov [#allocation6]   ;;  %s208_s22 = smov 128  }
   0x6   :  { %s28_s21 = sshll.u32 %s207_s20, 4  ;;  %s209_s23 = smov 8   ;;  %s29_s21 = int_to_ptr.vmem [resolvable:$true] %s28_s21 }
   0x7   :  { %34 = dma.hbm_to_vmem [thread:$0]  %s27_s19, 2048, %s29_s21, [#allocation7], %s208_s22, %s208_s22, %s209_s23  }
   0x8   :  { %200 = dma.done.wait [#allocation4], 128  }
   0x9   :  { %201 = vsyncadd [#allocation4], 4294967168 }
   0xa   :  { %202 = dma.done.wait [#allocation7], 2048  }
   0xb   :  { %203 = vsyncadd [#allocation7], 4294965248  ;;  %v61_v0 = vld [vmem:[#allocation6 + $0x78] sm:$0xff]  ;;  %v60_v1 = vld [vmem:[#allocation6 + $0x70] sm:$0xff]  ;;  %s210_s24 = smov [#allocation8]   ;;  %s111_s28 = sshll.u32 %s246_s3, 4  ;;  %s112_s28 = int_to_ptr.hbm [resolvable:$true] %s111_s28 }
   0xc   :  { %62 = vmatpush.msra.mxu0 %v61_v0  ;;  %v59_v2 = vld [vmem:[#allocation6 + $0x68] sm:$0xff]  ;;  %v58_v3 = vld [vmem:[#allocation6 + $0x60] sm:$0xff]  ;;  %v57_v4 = vld [vmem:[#allocation6 + $0x58] sm:$0xff]  ;;  %s109_s25 = sshll.u32 %s210_s24, 4  ;;  %s110_s25 = int_to_ptr.vmem [resolvable:$true] %s109_s25 }
   0xd   :  { %v56_v5 = vld [vmem:[#allocation6 + $0x50] sm:$0xff]  ;;  %v55_v6 = vld [vmem:[#allocation6 + $0x48] sm:$0xff]  ;;  %v54_v7 = vld [vmem:[#allocation6 + $0x40] sm:$0xff] }
   0xe   :  { %63 = vmatpush.msra.mxu0 %v60_v1  ;;  %v53_v8 = vld [vmem:[#allocation6 + $0x38] sm:$0xff]  ;;  %v52_v9 = vld [vmem:[#allocation6 + $0x30] sm:$0xff]  ;;  %v51_v10 = vld [vmem:[#allocation6 + $0x28] sm:$0xff] }
   0xf   :  { %v50_v11 = vld [vmem:[#allocation6 + $0x20] sm:$0xff]  ;;  %v49_v12 = vld [vmem:[#allocation6 + $0x18] sm:$0xff]  ;;  %v48_v13 = vld [vmem:[#allocation6 + $0x10] sm:$0xff] }
  0x10   :  { %64 = vmatpush.msra.mxu0 %v59_v2  ;;  %v47_v14 = vld [vmem:[#allocation6 + $0x8] sm:$0xff]  ;;  %v46_v15 = vld [vmem:[#allocation6] sm:$0xff]  ;;  %v45_v16 = vld [vmem:[#allocation3] sm:$0xff] }
  0x11   :  { %v127_v17 = vld [vmem:[%s245_s2] ss:$0 sm:$0xff] }
  0x12   :  { %65 = vmatpush.msra.mxu0 %v58_v3 }
  0x14   :  { %66 = vmatpush.msra.mxu0 %v57_v4 }
  0x16   :  { %67 = vmatpush.msra.mxu0 %v56_v5 }
  0x18   :  { %68 = vmatpush.msra.mxu0 %v55_v6 }
  0x1a   :  { %69 = vmatpush.msra.mxu0 %v54_v7 }
  0x1c   :  { %70 = vmatpush.msra.mxu0 %v53_v8 }
  0x1e   :  { %71 = vmatpush.msra.mxu0 %v52_v9 }
  0x20   :  { %72 = vmatpush.msra.mxu0 %v51_v10 }
  0x22   :  { %73 = vmatpush.msra.mxu0 %v50_v11 }
  0x24   :  { %74 = vmatpush.msra.mxu0 %v49_v12 }
  0x26   :  { %75 = vmatpush.msra.mxu0 %v48_v13 }
  0x28   :  { %76 = vmatpush.msra.mxu0 %v47_v14 }
  0x2a   :  { %77 = vmatpush.msra.mxu0 %v46_v15 }
  0x2b   :  { %78 = vmatmul.f32.vlgmr.msra.gmra.mxu0 %v45_v16 }
  0xa8   :  { %v79_v18 = vpop.f32.mrf.mxu0 }
  0xa9   :  { %v102_v19 = vadd.f32 %v127_v17, %v79_v18 }
  0xab   :  { %103 = vst [vmem:[#allocation8] sm:$0xff] %v102_v19 }
  0xac   :  { %114 = dma.vmem_to_hbm [thread:$0]  %s110_s25, 128, %s112_s28, [#allocation5]  }
  0xad   :  { %204 = dma.done.wait [#allocation5], 128  }
  0xae   :  { %205 = vsyncadd [#allocation5], 4294967168 }
  0xaf   :  { %119 = vsyncpa [#allocation4], 1 }
  0xb0   :  { %120 = vsyncpa [#allocation7], 1 }
  0xb1   :  { %121 = vsyncpa [#allocation5], 1 }

</bundles_post_ra>
